<compile_context>
chip_gen: v6e
topology: v6e:2x2x1
jax: 0.10.0
libtpu: 0.0.40
codegen_flags: <defaults>
</compile_context>

<pallas_src>
import functools

import jax
import jax.numpy as jnp
from jax.experimental import pallas as pl
from jax.experimental.pallas import tpu as pltpu

IN_DIM = 3
HIDDEN = 128
N_HEADS = 2  # row 0 = mu, row 1 = sigma


def actor_kernel(x_ref, wfc_ref, bfc_ref, wh_ref, bh_ref, out_ref):
    # x_ref  : (IN_DIM, TB)     batch on lanes (lane-dense)
    # wfc_ref: (HIDDEN, IN_DIM) fc weight, transposed
    # bfc_ref: (HIDDEN, 1)      fc bias (broadcast along lanes)
    # wh_ref : (N_HEADS, HIDDEN) fused mu/sigma head weight, transposed
    # bh_ref : (N_HEADS, 1)     fused head bias
    # out_ref: (N_HEADS, TB)    lane-dense output block

    # fc layer on the MXU: (128, 3) @ (3, TB) -> (128, TB), N = TB lane-dense.
    h = jnp.dot(wfc_ref[...], x_ref[...], preferred_element_type=jnp.float32)
    h = jnp.maximum(h + bfc_ref[...], 0.0)                     # bias + ReLU

    # Fused heads: (2, 128) @ (128, TB) -> (2, TB), still lane-dense.
    z = jnp.dot(wh_ref[...], h, preferred_element_type=jnp.float32) + bh_ref[...]

    # Per-head activations on separate row views: no iota/select, each
    # transcendental only runs on its own head.
    out_ref[0:1, :] = 2.0 * jnp.tanh(z[0:1, :])
    out_ref[1:2, :] = jax.nn.softplus(z[1:2, :])


def _round_up(x, m):
    return ((x + m - 1) // m) * m


@functools.partial(jax.jit, static_argnames=("block_b",))
def actor_forward(x, params, block_b=8192):
    """x: (B, 3) f32. Returns (mu, sigma), each (B, 1) f32."""
    wfc, bfc, wmu, bmu, wsg, bsg = params
    B = x.shape[0]

    # One-time layout prep (tiny XLA ops): batch onto lanes, fuse the two
    # heads into a single (2, 128) weight and (2, 1) bias.
    xT = x.T                                                    # (3, B)
    wfcT = wfc.T                                                # (128, 3)
    bfcT = bfc.reshape(HIDDEN, 1)                               # (128, 1)
    whT = jnp.concatenate([wmu, wsg], axis=1).T                 # (2, 128)
    bhT = jnp.concatenate([bmu, bsg], axis=1).reshape(N_HEADS, 1)  # (2, 1)

    # Batch tile: for small B use one full-extent block (any B allowed); for
    # large B use a lane-aligned tile (multiple of 128), capped so the grid
    # always has >= 2 steps (keeps both v7x TensorCores busy). The trailing
    # partial block is handled by Pallas's masked writeback - no pad/slice.
    if B <= 2 * 128:
        tb = B
    else:
        tb = min(_round_up(block_b, 128), _round_up(pl.cdiv(B, 2), 128))
    grid = (pl.cdiv(B, tb),)

    out = pl.pallas_call(
        actor_kernel,
        out_shape=jax.ShapeDtypeStruct((N_HEADS, B), jnp.float32),
        grid=grid,
        in_specs=[
            pl.BlockSpec((IN_DIM, tb), lambda i: (0, i)),
            # Weights/biases: constant index maps -> VMEM-resident across
            # grid steps (no re-DMA).
            pl.BlockSpec((HIDDEN, IN_DIM), lambda i: (0, 0)),
            pl.BlockSpec((HIDDEN, 1), lambda i: (0, 0)),
            pl.BlockSpec((N_HEADS, HIDDEN), lambda i: (0, 0)),
            pl.BlockSpec((N_HEADS, 1), lambda i: (0, 0)),
        ],
        out_specs=pl.BlockSpec((N_HEADS, tb), lambda i: (0, i)),
        compiler_params=pltpu.CompilerParams(
            dimension_semantics=("parallel",)),
    )(xT, wfcT, bfcT, whT, bhT)

    mu = out[0].reshape(B, 1)
    sigma = out[1].reshape(B, 1)
    return mu, sigma


def init_params(key):
    """Deterministic parameter init (uniform, PyTorch-Linear-style bounds)."""
    ks = jax.random.split(key, 6)

    def unif(k, shape, fan_in):
        bound = 1.0 / jnp.sqrt(float(fan_in))
        return jax.random.uniform(k, shape, jnp.float32, -bound, bound)

    wfc = unif(ks[0], (IN_DIM, HIDDEN), IN_DIM)
    bfc = unif(ks[1], (1, HIDDEN), IN_DIM)
    wmu = unif(ks[2], (HIDDEN, 1), HIDDEN)
    bmu = unif(ks[3], (1, 1), HIDDEN)
    wsg = unif(ks[4], (HIDDEN, 1), HIDDEN)
    bsg = unif(ks[5], (1, 1), HIDDEN)
    return (wfc, bfc, wmu, bmu, wsg, bsg)


def actor_reference(x, params):
    wfc, bfc, wmu, bmu, wsg, bsg = params
    h = jax.nn.relu(x @ wfc + bfc)
    mu = 2.0 * jnp.tanh(h @ wmu + bmu)
    sigma = jax.nn.softplus(h @ wsg + bsg)
    return mu, sigma


if __name__ == "__main__":
    key = jax.random.PRNGKey(0)
    k_x1, k_x2, k_x3, k_p = jax.random.split(key, 4)
    params = init_params(k_p)

    # Case 1: small batch (Pendulum-style state dim 3), single full-extent block.
    B1 = 8
    x1 = jax.random.normal(k_x1, (B1, IN_DIM), jnp.float32)
    mu1, sg1 = actor_forward(x1, params)
    jax.block_until_ready((mu1, sg1))
    mu1_ref, sg1_ref = actor_reference(x1, params)
    assert mu1.shape == (B1, 1) and sg1.shape == (B1, 1)
    assert jnp.allclose(mu1, mu1_ref, atol=1e-5, rtol=1e-5)
    assert jnp.allclose(sg1, sg1_ref, atol=1e-5, rtol=1e-5)

    # Case 2: non-multiple-of-8 small batch, still one block (exact extents).
    B2 = 20
    x2 = jax.random.normal(k_x2, (B2, IN_DIM), jnp.float32)
    mu2, sg2 = actor_forward(x2, params)
    jax.block_until_ready((mu2, sg2))
    mu2_ref, sg2_ref = actor_reference(x2, params)
    assert mu2.shape == (B2, 1) and sg2.shape == (B2, 1)
    assert jnp.allclose(mu2, mu2_ref, atol=1e-5, rtol=1e-5)
    assert jnp.allclose(sg2, sg2_ref, atol=1e-5, rtol=1e-5)

    # Case 3: multi-step grid with a trailing partial block (300 = 2*128 + 44)
    # -> exercises lane tiling + masked writeback of the last block.
    B3 = 300
    x3 = jax.random.normal(k_x3, (B3, IN_DIM), jnp.float32)
    mu3, sg3 = actor_forward(x3, params, block_b=128)
    jax.block_until_ready((mu3, sg3))
    mu3_ref, sg3_ref = actor_reference(x3, params)
    assert mu3.shape == (B3, 1) and sg3.shape == (B3, 1)
    assert jnp.allclose(mu3, mu3_ref, atol=1e-5, rtol=1e-5)
    assert jnp.allclose(sg3, sg3_ref, atol=1e-5, rtol=1e-5)

    print("KERNEL_OK")
</pallas_src>

<mosaic_0001>
module attributes {stable_mosaic.version = 11 : i64} {
  func.func @actor_kernel(%arg0: i32, %arg1: memref<3x8xf32, #tpu.memory_space<vmem>>, %arg2: memref<128x3xf32, #tpu.memory_space<vmem>>, %arg3: memref<128x1xf32, #tpu.memory_space<vmem>>, %arg4: memref<2x128xf32, #tpu.memory_space<vmem>>, %arg5: memref<2x1xf32, #tpu.memory_space<vmem>>, %arg6: memref<2x8xf32, #tpu.memory_space<vmem>>) attributes {dimension_semantics = [#tpu.dimension_semantics<parallel>], iteration_bounds = array<i64: 1>, scalar_prefetch = 0 : i64, scratch_operands = 0 : i64, tpu.core_type = #tpu.core_type<tc>, window_params = [{transform_indices = @transform_0, window_bounds = array<i64: 3, 8>}, {pipeline_mode = #tpu.pipeline_mode<synchronous>, transform_indices = @transform_1, window_bounds = array<i64: 128, 3>}, {pipeline_mode = #tpu.pipeline_mode<synchronous>, transform_indices = @transform_2, window_bounds = array<i64: 128, 1>}, {pipeline_mode = #tpu.pipeline_mode<synchronous>, transform_indices = @transform_3, window_bounds = array<i64: 2, 128>}, {pipeline_mode = #tpu.pipeline_mode<synchronous>, transform_indices = @transform_4, window_bounds = array<i64: 2, 1>}, {transform_indices = @transform_5, window_bounds = array<i64: 2, 8>}]} {
    %c0 = arith.constant 0 : index
    %c0_0 = arith.constant 0 : index
    %0 = vector.load %arg2[%c0, %c0_0] : memref<128x3xf32, #tpu.memory_space<vmem>>, vector<128x3xf32>
    %c0_1 = arith.constant 0 : index
    %c0_2 = arith.constant 0 : index
    %1 = vector.load %arg1[%c0_1, %c0_2] : memref<3x8xf32, #tpu.memory_space<vmem>>, vector<3x8xf32>
    %cst = arith.constant dense<0.000000e+00> : vector<128x8xf32>
    %2 = tpu.matmul %0, %1, %cst {dimension_numbers = #tpu.dot_dimension_numbers<[1], [0], [0], [1], [0, 0, 1, 1], [], []>} : vector<128x3xf32>, vector<3x8xf32>, vector<128x8xf32> -> vector<128x8xf32>
    %c0_3 = arith.constant 0 : index
    %c0_4 = arith.constant 0 : index
    %3 = vector.load %arg3[%c0_3, %c0_4] : memref<128x1xf32, #tpu.memory_space<vmem>>, vector<128x1xf32>
    %4 = vector.broadcast %3 : vector<128x1xf32> to vector<128x8xf32>
    %5 = arith.addf %2, %4 : vector<128x8xf32>
    %cst_5 = arith.constant 0.000000e+00 : f32
    %6 = vector.broadcast %cst_5 : f32 to vector<128x8xf32>
    %7 = arith.maximumf %5, %6 : vector<128x8xf32>
    %c0_6 = arith.constant 0 : index
    %c0_7 = arith.constant 0 : index
    %8 = vector.load %arg4[%c0_6, %c0_7] : memref<2x128xf32, #tpu.memory_space<vmem>>, vector<2x128xf32>
    %cst_8 = arith.constant dense<0.000000e+00> : vector<2x8xf32>
    %9 = tpu.matmul %8, %7, %cst_8 {dimension_numbers = #tpu.dot_dimension_numbers<[1], [0], [0], [1], [0, 0, 1, 1], [], []>} : vector<2x128xf32>, vector<128x8xf32>, vector<2x8xf32> -> vector<2x8xf32>
    %c0_9 = arith.constant 0 : index
    %c0_10 = arith.constant 0 : index
    %10 = vector.load %arg5[%c0_9, %c0_10] : memref<2x1xf32, #tpu.memory_space<vmem>>, vector<2x1xf32>
    %11 = vector.broadcast %10 : vector<2x1xf32> to vector<2x8xf32>
    %12 = arith.addf %9, %11 : vector<2x8xf32>
    %13 = vector.extract_strided_slice %12 {offsets = [0, 0], sizes = [1, 8], strides = [1, 1]} : vector<2x8xf32> to vector<1x8xf32>
    %14 = math.tanh %13 : vector<1x8xf32>
    %cst_11 = arith.constant 2.000000e+00 : f32
    %15 = vector.broadcast %cst_11 : f32 to vector<1x8xf32>
    %16 = arith.mulf %15, %14 : vector<1x8xf32>
    %c0_12 = arith.constant 0 : index
    %c0_13 = arith.constant 0 : index
    %17 = vector.load %arg6[%c0_12, %c0_13] : memref<2x8xf32, #tpu.memory_space<vmem>>, vector<1x8xf32>
    tpu.vector_store %arg6[%c0_12, %c0_13], %16 {strides = array<i32>} : memref<2x8xf32, #tpu.memory_space<vmem>>, vector<1x8xf32>,
    %18 = vector.extract_strided_slice %12 {offsets = [1, 0], sizes = [1, 8], strides = [1, 1]} : vector<2x8xf32> to vector<1x8xf32>
    %cst_14 = arith.constant 0.000000e+00 : f32
    %19 = vector.broadcast %cst_14 : f32 to vector<1x8xf32>
    %20 = arith.maximumf %18, %19 : vector<1x8xf32>
    %21 = vector.broadcast %cst_14 : f32 to vector<1x8xf32>
    %22 = arith.subf %18, %21 : vector<1x8xf32>
    %23 = arith.cmpf one, %22, %22 : vector<1x8xf32>
    %24 = vector.broadcast %cst_14 : f32 to vector<1x8xf32>
    %25 = arith.addf %18, %24 : vector<1x8xf32>
    %26 = math.absf %22 : vector<1x8xf32>
    %cst_15 = arith.constant 0.000000e+00 : f32
    %27 = vector.broadcast %cst_15 : f32 to vector<1x8xf32>
    %28 = arith.subf %27, %26 : vector<1x8xf32>
    %29 = math.exp %28 : vector<1x8xf32>
    %30 = math.log1p %29 : vector<1x8xf32>
    %31 = arith.addf %20, %30 : vector<1x8xf32>
    %32 = arith.select %23, %25, %31 : vector<1x8xi1>, vector<1x8xf32>
    %c1 = arith.constant 1 : index
    %c0_16 = arith.constant 0 : index
    %33 = vector.load %arg6[%c1, %c0_16] : memref<2x8xf32, #tpu.memory_space<vmem>>, vector<1x8xf32>
    tpu.vector_store %arg6[%c1, %c0_16], %32 {strides = array<i32>} : memref<2x8xf32, #tpu.memory_space<vmem>>, vector<1x8xf32>,
    return
  }
  func.func @transform_0(%arg0: i32) -> (i32, i32) {
    %c0_i32 = arith.constant 0 : i32
    %c0_i32_0 = arith.constant 0 : i32
    return %c0_i32, %arg0 : i32, i32
  }
  func.func @transform_1(%arg0: i32) -> (i32, i32) {
    %c0_i32 = arith.constant 0 : i32
    %c0_i32_0 = arith.constant 0 : i32
    %c0_i32_1 = arith.constant 0 : i32
    return %c0_i32, %c0_i32_0 : i32, i32
  }
  func.func @transform_2(%arg0: i32) -> (i32, i32) {
    %c0_i32 = arith.constant 0 : i32
    %c0_i32_0 = arith.constant 0 : i32
    %c0_i32_1 = arith.constant 0 : i32
    return %c0_i32, %c0_i32_0 : i32, i32
  }
  func.func @transform_3(%arg0: i32) -> (i32, i32) {
    %c0_i32 = arith.constant 0 : i32
    %c0_i32_0 = arith.constant 0 : i32
    %c0_i32_1 = arith.constant 0 : i32
    return %c0_i32, %c0_i32_0 : i32, i32
  }
  func.func @transform_4(%arg0: i32) -> (i32, i32) {
    %c0_i32 = arith.constant 0 : i32
    %c0_i32_0 = arith.constant 0 : i32
    %c0_i32_1 = arith.constant 0 : i32
    return %c0_i32, %c0_i32_0 : i32, i32
  }
  func.func @transform_5(%arg0: i32) -> (i32, i32) {
    %c0_i32 = arith.constant 0 : i32
    %c0_i32_0 = arith.constant 0 : i32
    return %c0_i32, %arg0 : i32, i32
  }
}

</mosaic_0001>

<bundles_post_ra>
// kernel: actor_forward.1
= control target key start
LH: loop header
LB: loop body
LE: loop exit
PB: predicated region body
PF: predicated region fallthrough
CT: control target
= control target key end

     0   :  { %vm182_vm0 = vcmask 1042432   ;;  %vm133_vm1 = vcmask 23552   ;;  %v575_v3 = vmov 0   ;;  %v576_v35 = vmov 0.0   ;;  %s764_s0 = inlined_call_operand.vmem [shape: f32[3,8], index: 0, kind: input, shape index: {}]   ;;  %s765_s1 = inlined_call_operand.vmem [shape: f32[128,3], index: 1, kind: input, shape index: {}]   ;;  %s766_s2 = inlined_call_operand.vmem [shape: f32[128,1], index: 2, kind: input, shape index: {}]   ;;  %s767_s4 = inlined_call_operand.vmem [shape: f32[2,1], index: 4, kind: input, shape index: {}]   ;;  %s768_s3 = inlined_call_operand.vmem [shape: f32[2,128], index: 3, kind: input, shape index: {}]   ;;  %s769_s5 = inlined_call_operand.vmem [shape: f32[2,8], index: 5, kind: output, shape index: {}]  }
   0x1   :  { %v36_v0 = vld [vmem:[%s764_s0] sm:$0x7]  ;;  %v21_v2 = vld [vmem:[%s765_s1 + $0x8] sm:$0xff]  ;;  %567 = vset.pattern.permute.xlu0 %v575_v3  ;;  %568 = vset.pattern.permute.xlu1 %v575_v3  ;;  %v22_v4 = vld [vmem:[%s765_s1 + $0x10] sm:$0xff]  ;;  %vm577_vm2 = vmmov 0   ;;  %vm426_vm3 = vcmask 57344  }
   0x2   :  { %v20_v1 = vld [vmem:[%s765_s1] sm:$0xff]  ;;  %503 = vmatprep.subr.msk.mxu0 %vm182_vm0, %v36_v0  ;;  %v23_v5 = vld [vmem:[%s765_s1 + $0x18] sm:$0xff]  ;;  %v50_v8 = vld [vmem:[%s766_s2 + $0x68] sm:$0xff]  ;;  %529 = vmatprep.subr.mxu1 %v576_v35  ;;  %vm446_vm5 = vcmask 58369  }
   0x3   :  { %505 = vmatprep.mubr.msk.f32.mxu0 %vm133_vm1, %v20_v1  ;;  %504 = vmatpush3.msk.msra.mxu0 %vm182_vm0, %v36_v0  ;;  %v24_v6 = vld [vmem:[%s765_s1 + $0x20] sm:$0xff]  ;;  %v52_v7 = vld [vmem:[%s766_s2 + $0x78] sm:$0xff]  ;;  %v51_v9 = vld [vmem:[%s766_s2 + $0x70] sm:$0xff] }
   0x4   :  { %506 = vmatmul.mubr.msk.f32.vlgmr.msra.gmra.mxu0 %vm133_vm1, %v21_v2  ;;  %130 = vperm.xlu0 %567, %v52_v7   ;;  %v25_v10 = vld [vmem:[%s765_s1 + $0x28] sm:$0xff]  ;;  %v49_v11 = vld [vmem:[%s766_s2 + $0x60] sm:$0xff]  ;;  %v26_v12 = vld [vmem:[%s765_s1 + $0x30] sm:$0xff] }
   0x5   :  { %508 = vmatprep.mubr.msk.f32.mxu0 %vm133_vm1, %v22_v4  ;;  %120 = vperm.xlu1 %568, %v50_v8   ;;  %v48_v13 = vld [vmem:[%s766_s2 + $0x58] sm:$0xff]  ;;  %v47_v15 = vld [vmem:[%s766_s2 + $0x50] sm:$0xff]  ;;  %v28_v16 = vld [vmem:[%s765_s1 + $0x40] sm:$0xff] }
   0x6   :  { %v27_v14 = vld [vmem:[%s765_s1 + $0x38] sm:$0xff]  ;;  %v46_v17 = vld [vmem:[%s766_s2 + $0x48] sm:$0xff]  ;;  %v45_v19 = vld [vmem:[%s766_s2 + $0x40] sm:$0xff]  ;;  %561 = vmatprep.mubr.msk.f32.mxu1 %vm577_vm2, %v576_v35 }
   0x7   :  { %v29_v18 = vld [vmem:[%s765_s1 + $0x48] sm:$0xff]  ;;  %v30_v20 = vld [vmem:[%s765_s1 + $0x50] sm:$0xff]  ;;  %v44_v21 = vld [vmem:[%s766_s2 + $0x38] sm:$0xff] }
   0x8   :  { %509 = vmatmul.mubr.msk.f32.gmra.mxu0 %vm133_vm1, %v23_v5  ;;  %125 = vperm.xlu0 %567, %v51_v9   ;;  %v31_v22 = vld [vmem:[%s765_s1 + $0x58] sm:$0xff]  ;;  %v43_v23 = vld [vmem:[%s766_s2 + $0x30] sm:$0xff]  ;;  %v32_v24 = vld [vmem:[%s765_s1 + $0x60] sm:$0xff] }
   0x9   :  { %511 = vmatprep.mubr.msk.f32.mxu0 %vm133_vm1, %v24_v6  ;;  %115 = vperm.xlu1 %568, %v49_v11   ;;  %v42_v25 = vld [vmem:[%s766_s2 + $0x28] sm:$0xff]  ;;  %v41_v27 = vld [vmem:[%s766_s2 + $0x20] sm:$0xff]  ;;  %v34_v28 = vld [vmem:[%s765_s1 + $0x70] sm:$0xff] }
   0xa   :  { %v33_v26 = vld [vmem:[%s765_s1 + $0x68] sm:$0xff]  ;;  %v40_v29 = vld [vmem:[%s766_s2 + $0x18] sm:$0xff]  ;;  %v39_v31 = vld [vmem:[%s766_s2 + $0x10] sm:$0xff] }
   0xb   :  { %v35_v30 = vld [vmem:[%s765_s1 + $0x78] sm:$0xff]  ;;  %v38_v32 = vld [vmem:[%s766_s2 + $0x8] sm:$0xff]  ;;  %v37_v33 = vld [vmem:[%s766_s2] sm:$0xff] }
   0xc   :  { %512 = vmatmul.mubr.msk.f32.gmra.mxu0 %vm133_vm1, %v25_v10  ;;  %110 = vperm.xlu0 %567, %v48_v13   ;;  %v348_v34 = vld [vmem:[%s767_s4] sm:$0x3] }
   0xd   :  { %514 = vmatprep.mubr.msk.f32.mxu0 %vm133_vm1, %v26_v12  ;;  %105 = vperm.xlu1 %568, %v47_v15  }
  0x10   :  { %515 = vmatmul.mubr.msk.f32.gmra.mxu0 %vm133_vm1, %v27_v14  ;;  %100 = vperm.xlu0 %567, %v46_v17  }
  0x11   :  { %517 = vmatprep.mubr.msk.f32.mxu0 %vm133_vm1, %v28_v16  ;;  %95 = vperm.xlu1 %568, %v45_v19  }
  0x14   :  { %518 = vmatmul.mubr.msk.f32.gmra.mxu0 %vm133_vm1, %v29_v18  ;;  %90 = vperm.xlu0 %567, %v44_v21  }
  0x15   :  { %520 = vmatprep.mubr.msk.f32.mxu0 %vm133_vm1, %v30_v20  ;;  %85 = vperm.xlu1 %568, %v43_v23  }
  0x18   :  { %521 = vmatmul.mubr.msk.f32.gmra.mxu0 %vm133_vm1, %v31_v22  ;;  %80 = vperm.xlu0 %567, %v42_v25  }
  0x19   :  { %523 = vmatprep.mubr.msk.f32.mxu0 %vm133_vm1, %v32_v24  ;;  %75 = vperm.xlu1 %568, %v41_v27  }
  0x1c   :  { %524 = vmatmul.mubr.msk.f32.gmra.mxu0 %vm133_vm1, %v33_v26  ;;  %70 = vperm.xlu0 %567, %v40_v29  }
  0x1d   :  { %526 = vmatprep.mubr.msk.f32.mxu0 %vm133_vm1, %v34_v28  ;;  %65 = vperm.xlu1 %568, %v39_v31  }
  0x20   :  { %527 = vmatmul.mubr.msk.f32.gmra.mxu0 %vm133_vm1, %v35_v30  ;;  %60 = vperm.xlu0 %567, %v38_v32  }
  0x21   :  { %55 = vperm.xlu1 %568, %v37_v33  }
  0x24   :  { %351 = vperm.xlu0 %567, %v348_v34  }
  0x7f   :  { %v131_v41 = vpop.permute.xlu0 %130 }
  0x80   :  { %v121_v43 = vpop.permute.xlu1 %120 }
  0x83   :  { %v126_v46 = vpop.permute.xlu0 %125 }
  0x84   :  { %v116_v48 = vpop.permute.xlu1 %115 }
  0x87   :  { %v111_v51 = vpop.permute.xlu0 %110 }
  0x88   :  { %v106_v53 = vpop.permute.xlu1 %105 }
  0x8b   :  { %v101_v56 = vpop.permute.xlu0 %100 }
  0x8c   :  { %v96_v59 = vpop.permute.xlu1 %95 }
  0x8f   :  { %v91_v2 = vpop.permute.xlu0 %90 }
  0x90   :  { %v86_v5 = vpop.permute.xlu1 %85 }
  0x93   :  { %v81_v10 = vpop.permute.xlu0 %80 }
  0x94   :  { %v76_v13 = vpop.permute.xlu1 %75 }
  0x97   :  { %v71_v18 = vpop.permute.xlu0 %70 }
  0x98   :  { %v66_v21 = vpop.permute.xlu1 %65 }
  0x9b   :  { %v61_v26 = vpop.permute.xlu0 %60 }
  0x9c   :  { %v56_v29 = vpop.permute.xlu1 %55 }
  0xc4   :  { %v728_v36 = vpop.f32.mrf.mxu0 }
  0xc5   :  { %v258_v30 = vadd.f32 %v728_v36, %v61_v26  ;;  %v347_v36 = vld [vmem:[%s768_s3] sm:$0x3] }
  0xc6   :  { %v730_v37 = vpop.f32.mrf.mxu0 }
  0xc7   :  { %v253_v32 = vadd.f32 %v730_v37, %v56_v29  ;;  %v332_v34 = vmax.f32 %v258_v30, 0.0 }
  0xc8   :  { %v732_v38 = vpop.f32.mrf.mxu0 }
  0xc9   :  { %v268_v24 = vadd.f32 %v732_v38, %v71_v18  ;;  %v331_v38 = vmax.f32 %v253_v32, 0.0 }
  0xca   :  { %v734_v39 = vpop.f32.mrf.mxu0 }
  0xcb   :  { %v263_v27 = vadd.f32 %v734_v39, %v66_v21  ;;  %v334_v31 = vmax.f32 %v268_v24, 0.0  ;;  %v352_v39 = vpop.permute.xlu0 %351 }
  0xcc   :  { %v513_v40 = vpop.f32.mrf.mxu0 }
  0xcd   :  { %v278_v19 = vadd.f32 %v513_v40, %v81_v10  ;;  %v333_v33 = vmax.f32 %v263_v27, 0.0 }
  0xce   :  { %v272_v42 = vpop.f32.mrf.mxu0 }
  0xcf   :  { %v273_v22 = vadd.f32 %v272_v42, %v76_v13  ;;  %v336_v25 = vmax.f32 %v278_v19, 0.0 }
  0xd0   :  { %v516_v44 = vpop.f32.mrf.mxu0 }
  0xd1   :  { %v288_v14 = vadd.f32 %v516_v44, %v91_v2  ;;  %v335_v28 = vmax.f32 %v273_v22, 0.0 }
  0xd2   :  { %v282_v45 = vpop.f32.mrf.mxu0 }
  0xd3   :  { %v283_v16 = vadd.f32 %v282_v45, %v86_v5  ;;  %v338_v20 = vmax.f32 %v288_v14, 0.0 }
  0xd4   :  { %v519_v47 = vpop.f32.mrf.mxu0 }
  0xd5   :  { %v298_v8 = vadd.f32 %v519_v47, %v101_v56  ;;  %v337_v23 = vmax.f32 %v283_v16, 0.0 }
  0xd6   :  { %v292_v49 = vpop.f32.mrf.mxu0 }
  0xd7   :  { %v293_v11 = vadd.f32 %v292_v49, %v96_v59  ;;  %v340_v15 = vmax.f32 %v298_v8, 0.0 }
  0xd8   :  { %v522_v50 = vpop.f32.mrf.mxu0 }
  0xd9   :  { %v308_v3 = vadd.f32 %v522_v50, %v111_v51  ;;  %v339_v17 = vmax.f32 %v293_v11, 0.0 }
  0xda   :  { %v302_v52 = vpop.f32.mrf.mxu0 }
  0xdb   :  { %v303_v6 = vadd.f32 %v302_v52, %v106_v53  ;;  %v342_v9 = vmax.f32 %v308_v3, 0.0 }
  0xdc   :  { %v525_v54 = vpop.f32.mrf.mxu0 }
  0xdd   :  { %v318_v61 = vadd.f32 %v525_v54, %v121_v43  ;;  %v341_v12 = vmax.f32 %v303_v6, 0.0 }
  0xde   :  { %v312_v55 = vpop.f32.mrf.mxu0 }
  0xdf   :  { %v313_v0 = vadd.f32 %v312_v55, %v116_v48  ;;  %v344_v4 = vmax.f32 %v318_v61, 0.0 }
  0xe0   :  { %v528_v57 = vpop.f32.mrf.mxu0 }
  0xe1   :  { %v328_v58 = vadd.f32 %v528_v57, %v131_v41  ;;  %v343_v7 = vmax.f32 %v313_v0, 0.0 }
  0xe2   :  { %v322_v60 = vpop.f32.mrf.mxu0 }
  0xe3   :  { %v346_v62 = vmax.f32 %v328_v58, 0.0  ;;  %v323_v63 = vadd.f32 %v322_v60, %v126_v46 }
  0xe5   :  { %v345_v1 = vmax.f32 %v323_v63, 0.0  ;;  %530 = vmatpush3.msra.mxu1 %v346_v62 }
  0xe6   :  { %531 = vmatprep.subr.mxu1 %v576_v35 }
  0xe7   :  { %532 = vmatpush3.msra.mxu1 %v345_v1 }
  0xe8   :  { %533 = vmatprep.subr.mxu1 %v576_v35 }
  0xe9   :  { %534 = vmatpush3.msra.mxu1 %v344_v4 }
  0xea   :  { %535 = vmatprep.subr.mxu1 %v576_v35 }
  0xeb   :  { %536 = vmatpush3.msra.mxu1 %v343_v7 }
  0xec   :  { %537 = vmatprep.subr.mxu1 %v576_v35 }
  0xed   :  { %538 = vmatpush3.msra.mxu1 %v342_v9 }
  0xee   :  { %539 = vmatprep.subr.mxu1 %v576_v35 }
  0xef   :  { %540 = vmatpush3.msra.mxu1 %v341_v12 }
  0xf0   :  { %541 = vmatprep.subr.mxu1 %v576_v35 }
  0xf1   :  { %542 = vmatpush3.msra.mxu1 %v340_v15 }
  0xf2   :  { %543 = vmatprep.subr.mxu1 %v576_v35 }
  0xf3   :  { %544 = vmatpush3.msra.mxu1 %v339_v17 }
  0xf4   :  { %545 = vmatprep.subr.mxu1 %v576_v35 }
  0xf5   :  { %546 = vmatpush3.msra.mxu1 %v338_v20 }
  0xf6   :  { %547 = vmatprep.subr.mxu1 %v576_v35 }
  0xf7   :  { %548 = vmatpush3.msra.mxu1 %v337_v23 }
  0xf8   :  { %549 = vmatprep.subr.mxu1 %v576_v35 }
  0xf9   :  { %550 = vmatpush3.msra.mxu1 %v336_v25 }
  0xfa   :  { %551 = vmatprep.subr.mxu1 %v576_v35 }
  0xfb   :  { %552 = vmatpush3.msra.mxu1 %v335_v28 }
  0xfc   :  { %553 = vmatprep.subr.mxu1 %v576_v35 }
  0xfd   :  { %554 = vmatpush3.msra.mxu1 %v334_v31 }
  0xfe   :  { %555 = vmatprep.subr.mxu1 %v576_v35 }
  0xff   :  { %556 = vmatpush3.msra.mxu1 %v333_v33 }
 0x100   :  { %557 = vmatprep.subr.mxu1 %v576_v35 }
 0x101   :  { %558 = vmatpush3.msra.mxu1 %v332_v34 }
 0x102   :  { %559 = vmatprep.subr.mxu1 %v576_v35 }
 0x103   :  { %560 = vmatpush3.msra.mxu1 %v331_v38 }
 0x104   :  { %562 = vmatmul.mubr.f32.vlgmr.msra.gmra.mxu1 %v347_v36 }
 0x1c4   :  { %v420_v37 = vpop.f32.mrf.mxu1 }
 0x1c5   :  { %v421_v40 = vadd.f32 %v420_v37, %v352_v39 }
 0x1c6   :  { %v563_v41 = vpop.f32.mrf.mxu1 }
 0x1c7   :  { %569 = vtanh.f32 %v421_v40  ;;  %v431_v42 = vand.u32 2147483647, %v421_v40  ;;  %v428_v54 = vmax.f32 %v421_v40, 0.0  ;;  %vm429_vm6 = vcmp.ne.f32.partialorder %v421_v40, %v421_v40 }
 0x1c9   :  { %v432_v43 = vsub.f32 0.0, %v431_v42 }
 0x1cb   :  { %v433_v44 = vmul.f32 1.442695, %v432_v43 }
 0x1cd   :  { %571 = vpow2.f32 %v433_v44 }
 0x1d4   :  { %v570_v45 = vpop.eup %569 }
 0x1d5   :  { %v425_v46 = vmul.f32 2.0, %v570_v45 }
 0x1d7   :  { %427 = vst.msk [vmem:[%s769_s5] sm:$0x1] %vm426_vm3, %v425_v46 }
 0x1da   :  { %v572_v47 = vpop.eup %571 }
 0x1db   :  { %v435_v35 = vadd.f32 1.0, %v572_v47  ;;  %v438_v48 = vmul.f32 -0.5, %v572_v47  ;;  %v441_v50 = vand.u32 2147483647, %v572_v47 }
 0x1dd   :  { %573 = vlog2.f32 %v435_v35  ;;  %v439_v49 = vadd.f32 1.0, %v438_v48  ;;  %vm442_vm4 = vcmp.lt.f32.partialorder %v441_v50, 0.0004427343 }
 0x1df   :  { %v440_v53 = vmul.f32 %v572_v47, %v439_v49 }
 0x1ea   :  { %v574_v51 = vpop.eup %573 }
 0x1eb   :  { %v437_v52 = vmul.f32 0.6931472, %v574_v51 }
 0x1ed   :  { %v443_v55 = vsel %vm442_vm4, %v440_v53, %v437_v52 }
 0x1ee   :  { %v444_v56 = vadd.f32 %v443_v55, %v428_v54 }
 0x1f0   :  { %v445_v57 = vsel %vm429_vm6, %v421_v40, %v444_v56 }
 0x1f1   :  { %447 = vst.msk [vmem:[%s769_s5] sm:$0x2] %vm446_vm5, %v445_v57 }

</bundles_post_ra>
